<compile_context>
chip_gen: v7x
topology: tpu7x:2x2x1
jax: 0.10.0
libtpu: 0.0.40
codegen_flags: <defaults>
</compile_context>

<pallas_src>
import functools

import jax
import jax.numpy as jnp
from jax import lax
from jax.experimental import pallas as pl
from jax.experimental.pallas import tpu as pltpu

BN_EPS = 1e-5
LANES = 128


def _round_up(n, m):
    return ((n + m - 1) // m) * m


def _bn_relu_linear(inv_b, z, g_ref, beta_ref, w2_ref, b2_ref, out_ref):
    """BatchNorm1d (training-mode batch stats) folded to scale/shift, ReLU, out linear."""
    # Two sublane reductions over the batch axis; no `centered` intermediate.
    mean = jnp.sum(z, axis=0, keepdims=True) * inv_b
    ex2 = jnp.sum(z * z, axis=0, keepdims=True) * inv_b
    var = jnp.maximum(ex2 - mean * mean, 0.0)          # guard tiny negative from cancellation
    s = g_ref[...] * lax.rsqrt(var + BN_EPS)           # rsqrt -> EUP slot
    shift = beta_ref[...] - mean * s
    h = jnp.maximum(z * s + shift, 0.0)                 # 1 mul + 1 add per element + relu

    out = jnp.dot(h.astype(jnp.bfloat16), w2_ref[...],
                  preferred_element_type=jnp.float32) + b2_ref[...]
    out_ref[...] = out.astype(out_ref.dtype)


def _sg_kernel_cond(inv_b, x_ref, y_ref, w1x_ref, w1y_ref, b1_ref, g_ref, beta_ref,
                    w2_ref, b2_ref, out_ref):
    """Conditioned path: concat(x, y) @ W1 fused as x @ W1[:dx] + y @ W1[dx:]."""
    z = (jnp.dot(x_ref[...].astype(jnp.bfloat16), w1x_ref[...],
                 preferred_element_type=jnp.float32)
         + jnp.dot(y_ref[...].astype(jnp.bfloat16), w1y_ref[...],
                   preferred_element_type=jnp.float32)
         + b1_ref[...])
    _bn_relu_linear(inv_b, z, g_ref, beta_ref, w2_ref, b2_ref, out_ref)


def _sg_kernel_uncond(inv_b, x_ref, w1_ref, b1_ref, g_ref, beta_ref,
                      w2_ref, b2_ref, out_ref):
    z = jnp.dot(x_ref[...].astype(jnp.bfloat16), w1_ref[...],
                preferred_element_type=jnp.float32) + b1_ref[...]
    _bn_relu_linear(inv_b, z, g_ref, beta_ref, w2_ref, b2_ref, out_ref)


def init_params(key, sg_input_size, hidden, input_size):
    """Logical (unpadded, f32) params: PyTorch-Linear-like uniform(+-1/sqrt(fan_in))."""
    k1, k2, k3, k4 = jax.random.split(key, 4)
    lim1 = 1.0 / jnp.sqrt(sg_input_size)
    lim2 = 1.0 / jnp.sqrt(hidden)
    w1 = jax.random.uniform(k1, (sg_input_size, hidden), jnp.float32, -lim1, lim1)
    b1 = jax.random.uniform(k2, (1, hidden), jnp.float32, -lim1, lim1)
    gamma = jnp.ones((1, hidden), jnp.float32)    # BatchNorm1d default weight
    beta = jnp.zeros((1, hidden), jnp.float32)    # BatchNorm1d default bias
    w2 = jax.random.uniform(k3, (hidden, input_size), jnp.float32, -lim2, lim2)
    b2 = jax.random.uniform(k4, (1, input_size), jnp.float32, -lim2, lim2)
    return w1, b1, gamma, beta, w2, b2


def pack_params(params, d_x, d_y, conditioned):
    """Pad feature dims to 128 lanes (zeros), split W1 rows for fused concat, cast weights bf16."""
    w1, b1, gamma, beta, w2, b2 = params
    hidden = w1.shape[1]
    input_size = w2.shape[1]
    hp = _round_up(hidden, LANES)
    op = _round_up(input_size, LANES)

    def pad2(a, rows, cols):
        return jnp.pad(a, ((0, rows - a.shape[0]), (0, cols - a.shape[1])))

    w1p = pad2(w1, w1.shape[0], hp)            # pad hidden (lane) dim only
    packed = {
        "b1": pad2(b1, 1, hp),
        "gamma": pad2(gamma, 1, hp),           # padded cols never reach the output
        "beta": pad2(beta, 1, hp),
        "w2": pad2(w2, hp, op).astype(jnp.bfloat16),   # padded rows/cols are zero
        "b2": pad2(b2, 1, op),
        "input_size": input_size,
        "hidden_pad": hp,
        "out_pad": op,
    }
    if conditioned:
        packed["w1x"] = w1p[:d_x].astype(jnp.bfloat16)
        packed["w1y"] = w1p[d_x:d_x + d_y].astype(jnp.bfloat16)
    else:
        packed["w1"] = w1p.astype(jnp.bfloat16)
    return packed


def sg_pallas_forward(x, y, packed, conditioned=True):
    """x: [B, input_size], y: [B, num_classes] (if conditioned)  ->  [B, input_size]"""
    B = x.shape[0]
    hp, op = packed["hidden_pad"], packed["out_pad"]

    if conditioned:
        assert y is not None
        kernel = functools.partial(_sg_kernel_cond, 1.0 / B)
        inputs = (x, y, packed["w1x"], packed["w1y"], packed["b1"],
                  packed["gamma"], packed["beta"], packed["w2"], packed["b2"])
        flops = 2 * B * (x.shape[1] * hp + y.shape[1] * hp + hp * op)
    else:
        kernel = functools.partial(_sg_kernel_uncond, 1.0 / B)
        inputs = (x, packed["w1"], packed["b1"],
                  packed["gamma"], packed["beta"], packed["w2"], packed["b2"])
        flops = 2 * B * (x.shape[1] * hp + hp * op)

    bytes_accessed = sum(int(a.nbytes) for a in inputs) + B * op * 4
    vmem_spec = pl.BlockSpec(memory_space=pltpu.MemorySpace.VMEM)

    out_pad = pl.pallas_call(
        kernel,
        out_shape=jax.ShapeDtypeStruct((B, op), jnp.float32),
        in_specs=[vmem_spec] * len(inputs),
        out_specs=vmem_spec,
        cost_estimate=pl.CostEstimate(flops=flops, transcendentals=hp,
                                      bytes_accessed=bytes_accessed),
        compiler_params=pltpu.CompilerParams(vmem_limit_bytes=32 * 1024 * 1024),
    )(*inputs)
    # Lane-dense (128-wide) store inside the kernel; slice real columns outside.
    return out_pad[:, :packed["input_size"]]


def synthetic_gradients_forward(x, y, packed, conditioned=True):
    return sg_pallas_forward(x, y, packed, conditioned=conditioned)


def _reference_forward(x, y, params, conditioned=True):
    """Pure-JAX f32 reference mirroring the PyTorch module (training-mode BN)."""
    w1, b1, gamma, beta, w2, b2 = params
    if conditioned:
        x = jnp.concatenate([x, y], axis=1)
    z = x @ w1 + b1
    mean = jnp.mean(z, axis=0, keepdims=True)
    var = jnp.mean((z - mean) ** 2, axis=0, keepdims=True)
    h = jnp.maximum((z - mean) / jnp.sqrt(var + BN_EPS) * gamma + beta, 0.0)
    return h @ w2 + b2


if __name__ == "__main__":
    # Small, forward-consistent shapes: batch=8, input_size=32, one hidden layer of 64,
    # num_classes=8, conditioned=True (so sg_input_size = 32 + 8 = 40).
    batch = 8
    input_size = 32
    hidden = 64
    num_classes = 8
    sg_input_size = input_size + num_classes

    key = jax.random.PRNGKey(0)
    kx, ky, kp = jax.random.split(key, 3)
    x = jax.random.normal(kx, (batch, input_size), jnp.float32)
    labels = jax.random.randint(ky, (batch,), 0, num_classes)
    y = jax.nn.one_hot(labels, num_classes, dtype=jnp.float32)

    params = init_params(kp, sg_input_size, hidden, input_size)
    packed = pack_params(params, d_x=input_size, d_y=num_classes, conditioned=True)

    out = synthetic_gradients_forward(x, y, packed, conditioned=True)
    out = jax.block_until_ready(out)

    ref = _reference_forward(x, y, params, conditioned=True)
    assert out.shape == (batch, input_size)
    # bf16 MXU operands (per perf review) -> loosened tolerance vs the f32 reference.
    assert jnp.allclose(out, ref, atol=5e-2, rtol=5e-2), "mismatch vs reference"

    print("KERNEL_OK")
</pallas_src>

<mosaic_0001>
module attributes {stable_mosaic.version = 11 : i64} {
  func.func @_sg_kernel_cond(%arg0: memref<8x32xf32, #tpu.memory_space<vmem>>, %arg1: memref<8x8xf32, #tpu.memory_space<vmem>>, %arg2: memref<32x128xbf16, #tpu.memory_space<vmem>>, %arg3: memref<8x128xbf16, #tpu.memory_space<vmem>>, %arg4: memref<1x128xf32, #tpu.memory_space<vmem>>, %arg5: memref<1x128xf32, #tpu.memory_space<vmem>>, %arg6: memref<1x128xf32, #tpu.memory_space<vmem>>, %arg7: memref<128x128xbf16, #tpu.memory_space<vmem>>, %arg8: memref<1x128xf32, #tpu.memory_space<vmem>>, %arg9: memref<8x128xf32, #tpu.memory_space<vmem>>) attributes {dimension_semantics = [], scalar_prefetch = 0 : i64, scratch_operands = 0 : i64, tpu.core_type = #tpu.core_type<tc>} {
    %c0 = arith.constant 0 : index
    %c0_0 = arith.constant 0 : index
    %0 = vector.load %arg0[%c0, %c0_0] : memref<8x32xf32, #tpu.memory_space<vmem>>, vector<8x32xf32>
    %1 = arith.truncf %0 : vector<8x32xf32> to vector<8x32xbf16>
    %c0_1 = arith.constant 0 : index
    %c0_2 = arith.constant 0 : index
    %2 = vector.load %arg2[%c0_1, %c0_2] : memref<32x128xbf16, #tpu.memory_space<vmem>>, vector<32x128xbf16>
    %cst = arith.constant dense<0.000000e+00> : vector<8x128xf32>
    %3 = tpu.matmul %1, %2, %cst {dimension_numbers = #tpu.dot_dimension_numbers<[1], [0], [0], [1], [0, 0, 1, 1], [], []>} : vector<8x32xbf16>, vector<32x128xbf16>, vector<8x128xf32> -> vector<8x128xf32>
    %c0_3 = arith.constant 0 : index
    %c0_4 = arith.constant 0 : index
    %4 = vector.load %arg1[%c0_3, %c0_4] : memref<8x8xf32, #tpu.memory_space<vmem>>, vector<8x8xf32>
    %5 = arith.truncf %4 : vector<8x8xf32> to vector<8x8xbf16>
    %c0_5 = arith.constant 0 : index
    %c0_6 = arith.constant 0 : index
    %6 = vector.load %arg3[%c0_5, %c0_6] : memref<8x128xbf16, #tpu.memory_space<vmem>>, vector<8x128xbf16>
    %cst_7 = arith.constant dense<0.000000e+00> : vector<8x128xf32>
    %7 = tpu.matmul %5, %6, %cst_7 {dimension_numbers = #tpu.dot_dimension_numbers<[1], [0], [0], [1], [0, 0, 1, 1], [], []>} : vector<8x8xbf16>, vector<8x128xbf16>, vector<8x128xf32> -> vector<8x128xf32>
    %8 = arith.addf %3, %7 : vector<8x128xf32>
    %c0_8 = arith.constant 0 : index
    %c0_9 = arith.constant 0 : index
    %9 = vector.load %arg4[%c0_8, %c0_9] : memref<1x128xf32, #tpu.memory_space<vmem>>, vector<1x128xf32>
    %10 = vector.broadcast %9 : vector<1x128xf32> to vector<8x128xf32>
    %11 = arith.addf %8, %10 : vector<8x128xf32>
    %cst_10 = arith.constant dense<0.000000e+00> : vector<128xf32>
    %12 = vector.multi_reduction <add>, %11, %cst_10 [0] : vector<8x128xf32> to vector<128xf32>
    %13 = vector.shape_cast %12 : vector<128xf32> to vector<1x128xf32>
    %cst_11 = arith.constant 1.250000e-01 : f32
    %14 = vector.broadcast %cst_11 : f32 to vector<1x128xf32>
    %15 = arith.mulf %13, %14 : vector<1x128xf32>
    %16 = arith.mulf %11, %11 : vector<8x128xf32>
    %cst_12 = arith.constant dense<0.000000e+00> : vector<128xf32>
    %17 = vector.multi_reduction <add>, %16, %cst_12 [0] : vector<8x128xf32> to vector<128xf32>
    %18 = vector.shape_cast %17 : vector<128xf32> to vector<1x128xf32>
    %cst_13 = arith.constant 1.250000e-01 : f32
    %19 = vector.broadcast %cst_13 : f32 to vector<1x128xf32>
    %20 = arith.mulf %18, %19 : vector<1x128xf32>
    %21 = arith.mulf %15, %15 : vector<1x128xf32>
    %22 = arith.subf %20, %21 : vector<1x128xf32>
    %cst_14 = arith.constant 0.000000e+00 : f32
    %23 = vector.broadcast %cst_14 : f32 to vector<1x128xf32>
    %24 = arith.maximumf %22, %23 : vector<1x128xf32>
    %c0_15 = arith.constant 0 : index
    %c0_16 = arith.constant 0 : index
    %25 = vector.load %arg5[%c0_15, %c0_16] : memref<1x128xf32, #tpu.memory_space<vmem>>, vector<1x128xf32>
    %cst_17 = arith.constant 9.99999974E-6 : f32
    %26 = vector.broadcast %cst_17 : f32 to vector<1x128xf32>
    %27 = arith.addf %24, %26 : vector<1x128xf32>
    %28 = math.rsqrt %27 : vector<1x128xf32>
    %29 = arith.mulf %25, %28 : vector<1x128xf32>
    %c0_18 = arith.constant 0 : index
    %c0_19 = arith.constant 0 : index
    %30 = vector.load %arg6[%c0_18, %c0_19] : memref<1x128xf32, #tpu.memory_space<vmem>>, vector<1x128xf32>
    %31 = arith.mulf %15, %29 : vector<1x128xf32>
    %32 = arith.subf %30, %31 : vector<1x128xf32>
    %33 = vector.broadcast %29 : vector<1x128xf32> to vector<8x128xf32>
    %34 = arith.mulf %11, %33 : vector<8x128xf32>
    %35 = vector.broadcast %32 : vector<1x128xf32> to vector<8x128xf32>
    %36 = arith.addf %34, %35 : vector<8x128xf32>
    %cst_20 = arith.constant 0.000000e+00 : f32
    %37 = vector.broadcast %cst_20 : f32 to vector<8x128xf32>
    %38 = arith.maximumf %36, %37 : vector<8x128xf32>
    %39 = arith.truncf %38 : vector<8x128xf32> to vector<8x128xbf16>
    %c0_21 = arith.constant 0 : index
    %c0_22 = arith.constant 0 : index
    %40 = vector.load %arg7[%c0_21, %c0_22] : memref<128x128xbf16, #tpu.memory_space<vmem>>, vector<128x128xbf16>
    %cst_23 = arith.constant dense<0.000000e+00> : vector<8x128xf32>
    %41 = tpu.matmul %39, %40, %cst_23 {dimension_numbers = #tpu.dot_dimension_numbers<[1], [0], [0], [1], [0, 0, 1, 1], [], []>} : vector<8x128xbf16>, vector<128x128xbf16>, vector<8x128xf32> -> vector<8x128xf32>
    %c0_24 = arith.constant 0 : index
    %c0_25 = arith.constant 0 : index
    %42 = vector.load %arg8[%c0_24, %c0_25] : memref<1x128xf32, #tpu.memory_space<vmem>>, vector<1x128xf32>
    %43 = vector.broadcast %42 : vector<1x128xf32> to vector<8x128xf32>
    %44 = arith.addf %41, %43 : vector<8x128xf32>
    %c0_26 = arith.constant 0 : index
    %c0_27 = arith.constant 0 : index
    %45 = vector.load %arg9[%c0_26, %c0_27] : memref<8x128xf32, #tpu.memory_space<vmem>>, vector<8x128xf32>
    tpu.vector_store %arg9[%c0_26, %c0_27], %44 {strides = array<i32>} : memref<8x128xf32, #tpu.memory_space<vmem>>, vector<8x128xf32>,
    return
  }
}

</mosaic_0001>

<bundles_post_ra>
// kernel: tpu_custom_call.1
= control target key start
LH: loop header
LB: loop body
LE: loop exit
PB: predicated region body
PF: predicated region fallthrough
CT: control target
= control target key end

     0   :  { %14 = vsyncpa [#allocation3], 0  ;;  %s714_s0 = inlined_call_operand.hbm [shape: f32[8,32], index: 0, kind: input, shape index: {}]   ;;  %s715_s1 = inlined_call_operand.hbm [shape: f32[8,8], index: 1, kind: input, shape index: {}]   ;;  %s716_s2 = inlined_call_operand.hbm [shape: bf16[32,128], index: 2, kind: input, shape index: {}]   ;;  %s717_s3 = inlined_call_operand.vmem [shape: bf16[8,128], index: 3, kind: input, shape index: {}]   ;;  %s718_s4 = inlined_call_operand.vmem [shape: f32[1,128], index: 4, kind: input, shape index: {}]   ;;  %s719_s5 = inlined_call_operand.vmem [shape: f32[1,128], index: 5, kind: input, shape index: {}]   ;;  %s720_s6 = inlined_call_operand.vmem [shape: f32[1,128], index: 6, kind: input, shape index: {}]   ;;  %s721_s7 = inlined_call_operand.hbm [shape: bf16[128,128], index: 7, kind: input, shape index: {}]   ;;  %s722_s8 = inlined_call_operand.vmem [shape: f32[1,128], index: 8, kind: input, shape index: {}]   ;;  %s723_s9 = inlined_call_operand.hbm [shape: f32[8,128], index: 9, kind: output, shape index: {}]  }
   0x1   :  { %15 = vsyncpa [#allocation6], 0 }
   0x2   :  { %16 = vsyncpa [#allocation9], 0 }
   0x3   :  { %17 = vsyncpa [#allocation4], 0  ;;  %s577_s30 = smov [#allocation5]   ;;  %s578_s11 = smov [#allocation2]  }
   0x4   :  { %s34_s10 = sshll.u32 %s577_s30, 4  ;;  %s24_s12 = sshll.u32 %s578_s11, 4  ;;  %s35_s10 = int_to_ptr.vmem [resolvable:$true] %s34_s10  ;;  %s25_s12 = int_to_ptr.vmem [resolvable:$true] %s24_s12 }
   0x5   :  { %s459_s15 = scalar_lea.hbm %s715_s1, 128 }
   0x6   :  { %p460_p0 = scmp.ne.s32.totalorder %s715_s1, %s459_s15  ;;  %p463_p1 = scmp.lt.u32.totalorder %s459_s15, %s715_s1 }
   0x8   :  { %p465_p2 = pnand %p463_p1, %p460_p0 }
   0xa   :  { %468 = shalt.err (!%p465_p2)
}
   0xb   :  { %s469_s20 = scalar_lea.vmem %s35_s10, 128  ;;  %p474_p4 = scmp.lt.s32.totalorder %s35_s10, %s35_s10 }
   0xc   :  { %p470_p3 = scmp.ne.s32.totalorder %s35_s10, %s469_s20  ;;  %p475_p5 = scmp.lt.s32.totalorder %s469_s20, %s469_s20 }
   0xe   :  { %p476_p6 = por %p475_p5, %p474_p4 }
  0x10   :  { %p477_p7 = pnand %p476_p6, %p470_p3 }
  0x12   :  { %480 = shalt.err (!%p477_p7)
}
  0x13   :  { %37 = dma.hbm_to_vmem [thread:$0]  %s715_s1, 128, %s35_s10, [#allocation6]  }
  0x14   :  { %s481_s25 = scalar_lea.hbm %s714_s0, 128 }
  0x15   :  { %p482_p8 = scmp.ne.s32.totalorder %s714_s0, %s481_s25  ;;  %p485_p9 = scmp.lt.u32.totalorder %s481_s25, %s714_s0 }
  0x17   :  { %p487_p10 = pnand %p485_p9, %p482_p8 }
  0x19   :  { %490 = shalt.err (!%p487_p10)
}
  0x1a   :  { %s491_s30 = scalar_lea.vmem %s25_s12, 128  ;;  %p496_p12 = scmp.lt.s32.totalorder %s25_s12, %s25_s12 }
  0x1b   :  { %p492_p11 = scmp.ne.s32.totalorder %s25_s12, %s491_s30  ;;  %p497_p13 = scmp.lt.s32.totalorder %s491_s30, %s491_s30 }
  0x1d   :  { %p498_p0 = por %p497_p13, %p496_p12 }
  0x1f   :  { %p499_p1 = pnand %p498_p0, %p492_p11 }
  0x21   :  { %502 = shalt.err (!%p499_p1)
}
  0x22   :  { %27 = dma.hbm_to_vmem [thread:$0]  %s714_s0, 128, %s25_s12, [#allocation3]  }
  0x23   :  { %s579_s11 = smov [#allocation7]   ;;  %s503_s16 = scalar_lea.hbm %s716_s2, 256 }
  0x24   :  { %s43_s13 = sshll.u32 %s579_s11, 4  ;;  %p504_p2 = scmp.ne.s32.totalorder %s716_s2, %s503_s16  ;;  %s44_s13 = int_to_ptr.vmem [resolvable:$true] %s43_s13 }
  0x25   :  { %p507_p3 = scmp.lt.u32.totalorder %s503_s16, %s716_s2 }
  0x27   :  { %p509_p4 = pnand %p507_p3, %p504_p2 }
  0x29   :  { %512 = shalt.err (!%p509_p4)
}
  0x2a   :  { %s513_s21 = scalar_lea.vmem %s44_s13, 256  ;;  %p518_p6 = scmp.lt.s32.totalorder %s44_s13, %s44_s13 }
  0x2b   :  { %p514_p5 = scmp.ne.s32.totalorder %s44_s13, %s513_s21  ;;  %p519_p7 = scmp.lt.s32.totalorder %s513_s21, %s513_s21 }
  0x2d   :  { %p520_p8 = por %p519_p7, %p518_p6 }
  0x2f   :  { %p521_p9 = pnand %p520_p8, %p514_p5 }
  0x31   :  { %524 = shalt.err (!%p521_p9)
}
  0x32   :  { %s580_s0 = smov 64   ;;  %s581_s12 = smov 4  }
  0x33   :  { %49 = dma.hbm_to_vmem [thread:$0]  %s716_s2, 256, %s44_s13, [#allocation6], %s580_s0, %s580_s0, %s581_s12  }
  0x34   :  { %s582_s24 = smov [#allocation8]   ;;  %s525_s28 = scalar_lea.hbm %s721_s7, 1024 }
  0x35   :  { %s63_s25 = sshll.u32 %s582_s24, 4  ;;  %p526_p10 = scmp.ne.s32.totalorder %s721_s7, %s525_s28  ;;  %s64_s25 = int_to_ptr.vmem [resolvable:$true] %s63_s25 }
  0x36   :  { %p529_p11 = scmp.lt.u32.totalorder %s525_s28, %s721_s7 }
  0x38   :  { %p531_p12 = pnand %p529_p11, %p526_p10 }
  0x3a   :  { %534 = shalt.err (!%p531_p12)
}
  0x3b   :  { %s535_s11 = scalar_lea.vmem %s64_s25, 1024  ;;  %p540_p0 = scmp.lt.s32.totalorder %s64_s25, %s64_s25 }
  0x3c   :  { %p536_p13 = scmp.ne.s32.totalorder %s64_s25, %s535_s11  ;;  %p541_p1 = scmp.lt.s32.totalorder %s535_s11, %s535_s11 }
  0x3e   :  { %p542_p2 = por %p541_p1, %p540_p0 }
  0x40   :  { %p543_p3 = pnand %p542_p2, %p536_p13 }
  0x42   :  { %546 = shalt.err (!%p543_p3)
}
  0x43   :  { %69 = dma.hbm_to_vmem [thread:$0]  %s721_s7, 1024, %s64_s25, [#allocation9], %s580_s0, %s580_s0, %s581_s12  }
  0x44   :  { %569 = dma.done.wait [#allocation3], 128  }
  0x45   :  { %570 = vsyncadd [#allocation3], 4294967168 }
  0x46   :  { %571 = dma.done.wait [#allocation6], 384  }
  0x47   :  { %572 = vsyncadd [#allocation6], 4294966912 }
  0x48   :  { %573 = dma.done.wait [#allocation9], 1024  }
  0x49   :  { %574 = vsyncadd [#allocation9], 4294966272  ;;  %v583_v0 = vmov 0.0   ;;  %vm584_vm0 = vmmov 0   ;;  %vm98_vm1 = vcmask 1043456   ;;  %v91_v2 = vld [vmem:[#allocation5] sm:$0xff]  ;;  %v232_v47 = vlaneseq }
  0x4a   :  { %404 = vmatprep.subr.bf16.mxu1 %v583_v0  ;;  %406 = vmatprep.mubr.msk.bf16.mxu1 %vm584_vm0, %v583_v0  ;;  %v93_v1 = vld [vmem:[%s717_s3] sm:$0xf]  ;;  %v92_v4 = vpack.c.bf16 %v91_v2, %v91_v2  ;;  %vm94_vm2 = vcmask 64512   ;;  %v447_v5 = vld [vmem:[#allocation7] sm:$0xff]   ;;  %v448_v6 = vld [vmem:[#allocation7 + $0x8] sm:$0xff]   ;;  %vm154_vm3 = vcmask 261120  }
  0x4b   :  { %418 = vmatprep.subr.bf16.mxu0 %v583_v0  ;;  %434 = vmatprep.mubr.msk.bf16.mxu0 %vm584_vm0, %v583_v0  ;;  %v100_v3 = vsel %vm98_vm1, %v93_v1, 0  ;;  %v85_v7 = vld [vmem:[#allocation2] sm:$0xff]  ;;  %v450_v10 = vld [vmem:[#allocation8 + $0x8] sm:$0xff]   ;;  %v451_v11 = vld [vmem:[#allocation8 + $0x10] sm:$0xff]   ;;  %v233_v48 = vshrl.u32 %v232_v47, 7 }
  0x4c   :  { %405 = vmatpush3.bf16.msra.mxu1 %v100_v3  ;;  %v86_v8 = vpack.c.bf16 %v85_v7, %v85_v7  ;;  %v449_v9 = vld [vmem:[#allocation8] sm:$0xff]   ;;  %v452_v12 = vld [vmem:[#allocation8 + $0x18] sm:$0xff]   ;;  %v454_v14 = vld [vmem:[#allocation8 + $0x28] sm:$0xff]  }
  0x4d   :  { %410 = vmatprep.subr.bf16.mxu1 %v583_v0  ;;  %419 = vmatpush3.bf16.msra.mxu0 %v449_v9  ;;  %v453_v13 = vld [vmem:[#allocation8 + $0x20] sm:$0xff]   ;;  %v455_v15 = vld [vmem:[#allocation8 + $0x30] sm:$0xff]   ;;  %v456_v16 = vld [vmem:[#allocation8 + $0x38] sm:$0xff]   ;;  %v234_v50 = vsub.s32 0, %v233_v48 }
  0x4e   :  { %420 = vmatprep.subr.bf16.mxu0 %v583_v0  ;;  %v380_v22 = vld [vmem:[%s718_s4] ss:$0 sm:$0xff] }
  0x4f   :  { %407 = vmatmul.mubr.msk.bf16.vlgmr.msra.gmra.mrb[0].mxu1 %vm94_vm2, %v92_v4  ;;  %v224_v49 = vld [vmem:[%s719_s5] sm:$0x1]  ;;  %s585_s5 = smov [#allocation10]  }
  0x50   :  { %411 = vmatpush3.bf16.msra.mxu1 %v447_v5  ;;  %414 = vmatprep.mubr.msk.bf16.mxu1 %vm584_vm0, %v583_v0  ;;  %v228_v53 = vld [vmem:[%s720_s6] sm:$0x1]  ;;  %s365_s21 = sshll.u32 %s585_s5, 4  ;;  %s366_s21 = int_to_ptr.vmem [resolvable:$true] %s365_s21 }
  0x51   :  { %412 = vmatprep.subr.bf16.mxu1 %v583_v0  ;;  %421 = vmatpush3.bf16.msra.mxu0 %v450_v10  ;;  %v381_v62 = vld [vmem:[%s722_s8] ss:$0 sm:$0xff]  ;;  %s547_s6 = scalar_lea.vmem %s366_s21, 128  ;;  %p552_p5 = scmp.lt.s32.totalorder %s366_s21, %s366_s21 }
  0x52   :  { %422 = vmatprep.subr.bf16.mxu0 %v583_v0  ;;  %p548_p4 = scmp.ne.s32.totalorder %s366_s21, %s547_s6  ;;  %p553_p6 = scmp.lt.s32.totalorder %s547_s6, %s547_s6 }
  0x54   :  { %413 = vmatpush3.bf16.msra.mxu1 %v448_v6  ;;  %p554_p7 = por %p553_p6, %p552_p5 }
  0x55   :  { %423 = vmatpush3.bf16.msra.mxu0 %v451_v11 }
  0x56   :  { %424 = vmatprep.subr.bf16.mxu0 %v583_v0  ;;  %p555_p8 = pnand %p554_p7, %p548_p4 }
  0x57   :  { %415 = vmatmul.mubr.msk.bf16.vlgmr.msra.gmra.mrb[4].mxu1 %vm154_vm3, %v86_v8 }
  0x59   :  { %425 = vmatpush3.bf16.msra.mxu0 %v452_v12 }
  0x5a   :  { %426 = vmatprep.subr.bf16.mxu0 %v583_v0 }
  0x5d   :  { %427 = vmatpush3.bf16.msra.mxu0 %v453_v13 }
  0x5e   :  { %428 = vmatprep.subr.bf16.mxu0 %v583_v0 }
  0x61   :  { %429 = vmatpush3.bf16.msra.mxu0 %v454_v14 }
  0x62   :  { %430 = vmatprep.subr.bf16.mxu0 %v583_v0 }
  0x65   :  { %431 = vmatpush3.bf16.msra.mxu0 %v455_v15 }
  0x66   :  { %432 = vmatprep.subr.bf16.mxu0 %v583_v0 }
  0x69   :  { %433 = vmatpush3.bf16.msra.mxu0 %v456_v16 }
 0x122   :  { %v136_v17 = vpop.f32.mrb[0].mxu1 }
 0x123   :  { %v408_v18 = vpop.f32.mrb[1].mxu1 }
 0x124   :  { %v139_v19 = vpop.f32.mrb[2].mxu1 }
 0x125   :  { %v409_v20 = vpop.f32.mrb[3].mxu1 }
 0x12a   :  { %v192_v21 = vpop.f32.mrb[4].mxu1 }
 0x12b   :  { %v193_v23 = vadd.f32 %v192_v21, %v136_v17  ;;  %v416_v24 = vpop.f32.mrb[5].mxu1 }
 0x12c   :  { %v195_v25 = vpop.f32.mrb[6].mxu1 }
 0x12d   :  { %v205_v26 = vadd.f32 %v380_v22, %v193_v23  ;;  %v417_v27 = vpop.f32.mrb[7].mxu1 }
 0x12f   :  { %v206_v28 = vrot.slane %v205_v26, 4  ;;  %v213_v29 = vmul.f32 %v205_v26, %v205_v26 }
 0x131   :  { %v207_v30 = vadd.f32 %v206_v28, %v205_v26  ;;  %v214_v31 = vrot.slane %v213_v29, 4 }
 0x133   :  { %v208_v32 = vrot.slane %v207_v30, 2  ;;  %v215_v33 = vadd.f32 %v214_v31, %v213_v29 }
 0x135   :  { %v209_v34 = vadd.f32 %v208_v32, %v207_v30  ;;  %v216_v35 = vrot.slane %v215_v33, 2 }
 0x137   :  { %v210_v36 = vrot.slane %v209_v34, 1  ;;  %v217_v37 = vadd.f32 %v216_v35, %v215_v33 }
 0x139   :  { %v218_v38 = vrot.slane %v217_v37, 1  ;;  %v211_v39 = vadd.f32 %v210_v36, %v209_v34 }
 0x13b   :  { %v219_v40 = vadd.f32 %v218_v38, %v217_v37  ;;  %v212_v41 = vmul.f32 0.125, %v211_v39 }
 0x13d   :  { %v220_v42 = vmul.f32 0.125, %v219_v40  ;;  %v221_v43 = vmul.f32 %v212_v41, %v212_v41 }
 0x13f   :  { %v222_v44 = vsub.f32 %v220_v42, %v221_v43 }
 0x141   :  { %v223_v45 = vmax.f32 %v222_v44, 0.0 }
 0x143   :  { %v225_v46 = vadd.f32 1e-05, %v223_v45 }
 0x145   :  { %457 = vrsqrt.f32 %v225_v46 }
 0x14f   :  { %v458_v51 = vpop.eup %457 }
 0x150   :  { %v227_v52 = vmul.f32 %v458_v51, %v224_v49 }
 0x152   :  { %v229_v54 = vmul.f32 %v227_v52, %v212_v41  ;;  %v235_v55 = vrot.slane %v227_v52, %v234_v50 }
 0x154   :  { %v230_v56 = vsub.f32 %v228_v53, %v229_v54  ;;  %v237_v57 = vmul.f32 %v235_v55, %v205_v26 }
 0x156   :  { %v242_v58 = vrot.slane %v230_v56, %v234_v50 }
 0x158   :  { %v244_v59 = vadd.f32 %v242_v58, %v237_v57 }
 0x15a   :  { %v245_v60 = vmax.f32 %v244_v59, 0.0 }
 0x15c   :  { %v246_v61 = vpack.c.bf16 %v245_v60, %v245_v60 }
 0x15e   :  { %435 = vmatmul.mubr.bf16.vlgmr.msra.gmra.mrb[0].mxu0 %v246_v61 }
 0x231   :  { %v352_v63 = vpop.f32.mrb[0].mxu0 }
 0x232   :  { %v353_v0 = vadd.f32 %v381_v62, %v352_v63  ;;  %v436_v1 = vpop.f32.mrb[1].mxu0 }
 0x233   :  { %v355_v2 = vpop.f32.mrb[2].mxu0 }
 0x234   :  { %358 = vst [vmem:[#allocation10] sm:$0xff] %v353_v0  ;;  %v437_v3 = vpop.f32.mrb[3].mxu0 }
 0x235   :  { %558 = shalt.err (!%p555_p8)
}
 0x236   :  { %s559_s8 = scalar_lea.hbm %s723_s9, 128 }
 0x237   :  { %p560_p9 = scmp.ne.s32.totalorder %s723_s9, %s559_s8  ;;  %p563_p10 = scmp.lt.u32.totalorder %s559_s8, %s723_s9 }
 0x239   :  { %p565_p11 = pnand %p563_p10, %p560_p9 }
 0x23b   :  { %568 = shalt.err (!%p565_p11)
}
 0x23c   :  { %368 = dma.vmem_to_hbm [thread:$0]  %s366_s21, 128, %s723_s9, [#allocation4]  }
 0x23d   :  { %575 = dma.done.wait [#allocation4], 128  }
 0x23e   :  { %576 = vsyncadd [#allocation4], 4294967168 }
 0x23f   :  { %372 = vsyncpa [#allocation3], 1 }
 0x240   :  { %373 = vsyncpa [#allocation6], 1 }
 0x241   :  { %374 = vsyncpa [#allocation9], 1 }
 0x242   :  { %375 = vsyncpa [#allocation4], 1 }

</bundles_post_ra>
